<compile_context>
chip_gen: v5e
topology: v5e:2x2
jax: 0.10.0
libtpu: 0.0.40
codegen_flags: <defaults>
</compile_context>

<pallas_src>
import functools

import jax
import jax.numpy as jnp
from jax.experimental import pallas as pl
from jax.experimental.pallas import tpu as pltpu

D_IN, H1, H2, D_OUT = 4, 16, 8, 1

# Packed-parameter slab layout: one (32, 32) f32 array (PyTorch (out, in) weights).
#   rows  0:16 : [ W1 (16, 4) | b1 (16, 1) ]   -> cols 0:4,  col 4
#   rows 16:24 : [ W2 (8, 16) | b2 (8, 1)  ]   -> cols 0:16, col 16
#   rows 24:32 : col 0 = W3 stored as a COLUMN (8,) ; (row 24, col 1) = b3
SLAB_ROWS, SLAB_COLS = 32, 32
_L2_ROW, _L3_ROW = 16, 24

# Batch-tile cap (lanes). 32768 lanes ~= 10-12 MiB of VMEM including sublane
# padding, double buffering and the h1/h2 dot intermediates -> safe on all gens.
_TILE_CAP = 32768
_VMEM_LIMIT = 32 * 1024 * 1024


def survival_mlp_kernel(xt_ref, p_ref, o_ref):
    """One lane-dense batch tile per grid step; all three layers fused in VMEM.

    xt_ref: (D_IN, bm) bf16   batch on lanes
    p_ref : (32, 32)   f32    packed weights/biases (see slab layout above)
    o_ref : (1, bm)    f32    lane-dense output tile
    """
    p = p_ref[...]
    w1 = p[0:H1, 0:D_IN].astype(jnp.bfloat16)              # (16, 4)  bf16
    b1 = p[0:H1, D_IN:D_IN + 1]                             # (16, 1)  f32
    w2 = p[_L2_ROW:_L2_ROW + H2, 0:H1].astype(jnp.bfloat16)  # (8, 16) bf16
    b2 = p[_L2_ROW:_L2_ROW + H2, H1:H1 + 1]                 # (8, 1)   f32
    w3c = p[_L3_ROW:_L3_ROW + H2, 0:1]                      # (8, 1)   f32 (column)
    b3 = p[_L3_ROW:_L3_ROW + 1, 1:2]                        # (1, 1)   f32

    xt = xt_ref[...]                                         # (4, bm) bf16

    # Layers 1 & 2 on the MXU: single-pass bf16 matmuls with f32 accumulation.
    h1 = jnp.maximum(
        jnp.dot(w1, xt, preferred_element_type=jnp.float32) + b1, 0.0)        # (16, bm)
    h2 = jnp.maximum(
        jnp.dot(w2, h1.astype(jnp.bfloat16),
                preferred_element_type=jnp.float32) + b2, 0.0)                # (8, bm)

    # Layer 3 (K=8, out=1) off the MXU: VPU broadcast-MAC + 8-sublane reduction
    # (XLU), keeping the final layer in full f32 precision.
    z = jnp.sum(w3c * h2, axis=0, keepdims=True) + b3                          # (1, bm)

    # Stable sigmoid on the EUP: sigmoid(z) = 0.5 * (tanh(z/2) + 1).
    o_ref[...] = (0.5 * (jnp.tanh(0.5 * z) + 1.0)).astype(o_ref.dtype)


def _round_up(n, m):
    return ((n + m - 1) // m) * m


def pack_params(params):
    """Pack PyTorch-layout params (W: (out, in), b: (out,)) into one (32, 32) slab."""
    slab = jnp.zeros((SLAB_ROWS, SLAB_COLS), jnp.float32)
    slab = slab.at[0:H1, 0:D_IN].set(params["w1"])
    slab = slab.at[0:H1, D_IN].set(params["b1"])
    slab = slab.at[_L2_ROW:_L2_ROW + H2, 0:H1].set(params["w2"])
    slab = slab.at[_L2_ROW:_L2_ROW + H2, H1].set(params["b2"])
    slab = slab.at[_L3_ROW:_L3_ROW + H2, 0].set(params["w3"][0])   # w3 as a column
    slab = slab.at[_L3_ROW, 1].set(params["b3"][0])
    return slab


def _run_tiled(xt_padded, param_slab, tile, grid, b_padded):
    """xt_padded: (D_IN, b_padded) bf16, lane-major. Returns (D_OUT, b_padded) f32."""
    return pl.pallas_call(
        survival_mlp_kernel,
        out_shape=jax.ShapeDtypeStruct((D_OUT, b_padded), jnp.float32),
        grid_spec=pltpu.PrefetchScalarGridSpec(
            num_scalar_prefetch=0,
            grid=(grid,),
            in_specs=[
                pl.BlockSpec((D_IN, tile), lambda i: (0, i)),            # xT batch tile
                pl.BlockSpec((SLAB_ROWS, SLAB_COLS), lambda i: (0, 0)),  # packed params
            ],
            out_specs=pl.BlockSpec((D_OUT, tile), lambda i: (0, i)),     # lane-dense out
        ),
        compiler_params=pltpu.CompilerParams(
            dimension_semantics=("parallel",),
            vmem_limit_bytes=_VMEM_LIMIT,
        ),
    )(xt_padded, param_slab)


@functools.partial(jax.jit, static_argnames=("tile_cap",))
def survival_model_forward(x, param_slab, *, tile_cap=_TILE_CAP):
    """x: (B, 4) float32 (PyTorch layout). param_slab: (32, 32). Returns (B, 1) f32."""
    B = x.shape[0]
    # Single grid step up to the cap (no forced splitting on 1-TC parts); very
    # large batches automatically yield >=2 parallel steps for v7x's 2 TCs.
    tile = min(_round_up(B, 128), tile_cap)
    b_padded = _round_up(B, tile)
    grid = b_padded // tile

    # One fused XLA pass: transpose + bf16 cast (halves the extra-pass bytes) + pad.
    xt = jnp.pad(x.T.astype(jnp.bfloat16), ((0, 0), (0, b_padded - B)))  # (4, Bp) bf16

    out_t = _run_tiled(xt, param_slab, tile, grid, b_padded)             # (1, Bp) f32
    # Slice + reshape (no transpose copy): (1, Bp) -> (B, 1).
    return out_t[0, :B][:, None]


@functools.partial(jax.jit, static_argnames=("tile_cap",))
def survival_model_forward_features_major(xt, param_slab, *, tile_cap=_TILE_CAP):
    """Features-major contract: xt is (4, B); skips the wrapper transpose pass."""
    B = xt.shape[1]
    tile = min(_round_up(B, 128), tile_cap)
    b_padded = _round_up(B, tile)
    grid = b_padded // tile
    xt_p = jnp.pad(xt.astype(jnp.bfloat16), ((0, 0), (0, b_padded - B)))
    out_t = _run_tiled(xt_p, param_slab, tile, grid, b_padded)
    return out_t[0, :B][:, None]


def init_params(key):
    """Deterministic synthetic params in PyTorch nn.Linear layout (W: (out, in))."""
    ks = jax.random.split(key, 6)

    def lin(kw, kb, fan_in, fan_out):
        bound = 1.0 / jnp.sqrt(jnp.float32(fan_in))
        w = jax.random.uniform(kw, (fan_out, fan_in), jnp.float32, -bound, bound)
        b = jax.random.uniform(kb, (fan_out,), jnp.float32, -bound, bound)
        return w, b

    w1, b1 = lin(ks[0], ks[1], D_IN, H1)
    w2, b2 = lin(ks[2], ks[3], H1, H2)
    w3, b3 = lin(ks[4], ks[5], H2, D_OUT)
    return dict(w1=w1, b1=b1, w2=w2, b2=b2, w3=w3, b3=b3)


def reference_forward(x, p):
    h1 = jnp.maximum(x @ p["w1"].T + p["b1"], 0.0)
    h2 = jnp.maximum(h1 @ p["w2"].T + p["b2"], 0.0)
    return jax.nn.sigmoid(h2 @ p["w3"].T + p["b3"])


if __name__ == "__main__":
    key = jax.random.PRNGKey(0)
    k_x, k_p = jax.random.split(key)
    B = 16
    x = jax.random.normal(k_x, (B, D_IN), jnp.float32)
    params = init_params(k_p)
    slab = pack_params(params)

    out = survival_model_forward(x, slab)
    out = jax.block_until_ready(out)

    ref = reference_forward(x, params)
    assert out.shape == (B, D_OUT)
    # bf16 MXU inputs for layers 1-2 (final layer kept in f32) -> looser tolerance.
    assert jnp.allclose(out, ref, atol=5e-3, rtol=5e-3), float(jnp.max(jnp.abs(out - ref)))

    # Also exercise the features-major (transpose-free) entry point.
    out_fm = jax.block_until_ready(survival_model_forward_features_major(x.T, slab))
    assert jnp.allclose(out_fm, ref, atol=5e-3, rtol=5e-3)

    print("KERNEL_OK")
</pallas_src>

<mosaic_0001>
module attributes {stable_mosaic.version = 11 : i64} {
  func.func @survival_mlp_kernel(%arg0: i32, %arg1: memref<4x128xbf16, #tpu.memory_space<vmem>>, %arg2: memref<32x32xf32, #tpu.memory_space<vmem>>, %arg3: memref<1x128xf32, #tpu.memory_space<vmem>>) attributes {dimension_semantics = [#tpu.dimension_semantics<parallel>], iteration_bounds = array<i64: 1>, scalar_prefetch = 0 : i64, scratch_operands = 0 : i64, tpu.core_type = #tpu.core_type<tc>, window_params = [{transform_indices = @transform_0, window_bounds = array<i64: 4, 128>}, {pipeline_mode = #tpu.pipeline_mode<synchronous>, transform_indices = @transform_1, window_bounds = array<i64: 32, 32>}, {transform_indices = @transform_2, window_bounds = array<i64: 1, 128>}]} {
    %c0 = arith.constant 0 : index
    %c0_0 = arith.constant 0 : index
    %0 = vector.load %arg2[%c0, %c0_0] : memref<32x32xf32, #tpu.memory_space<vmem>>, vector<32x32xf32>
    %1 = vector.extract_strided_slice %0 {offsets = [0, 0], sizes = [16, 4], strides = [1, 1]} : vector<32x32xf32> to vector<16x4xf32>
    %2 = arith.truncf %1 : vector<16x4xf32> to vector<16x4xbf16>
    %3 = vector.extract_strided_slice %0 {offsets = [0, 4], sizes = [16, 1], strides = [1, 1]} : vector<32x32xf32> to vector<16x1xf32>
    %4 = vector.extract_strided_slice %0 {offsets = [16, 0], sizes = [8, 16], strides = [1, 1]} : vector<32x32xf32> to vector<8x16xf32>
    %5 = arith.truncf %4 : vector<8x16xf32> to vector<8x16xbf16>
    %6 = vector.extract_strided_slice %0 {offsets = [16, 16], sizes = [8, 1], strides = [1, 1]} : vector<32x32xf32> to vector<8x1xf32>
    %7 = vector.extract_strided_slice %0 {offsets = [24, 0], sizes = [8, 1], strides = [1, 1]} : vector<32x32xf32> to vector<8x1xf32>
    %8 = vector.extract_strided_slice %0 {offsets = [24, 1], sizes = [1, 1], strides = [1, 1]} : vector<32x32xf32> to vector<1x1xf32>
    %c0_1 = arith.constant 0 : index
    %c0_2 = arith.constant 0 : index
    %9 = vector.load %arg1[%c0_1, %c0_2] : memref<4x128xbf16, #tpu.memory_space<vmem>>, vector<4x128xbf16>
    %cst = arith.constant dense<0.000000e+00> : vector<16x128xf32>
    %10 = tpu.matmul %2, %9, %cst {dimension_numbers = #tpu.dot_dimension_numbers<[1], [0], [0], [1], [0, 0, 1, 1], [], []>} : vector<16x4xbf16>, vector<4x128xbf16>, vector<16x128xf32> -> vector<16x128xf32>
    %11 = vector.broadcast %3 : vector<16x1xf32> to vector<16x128xf32>
    %12 = arith.addf %10, %11 : vector<16x128xf32>
    %cst_3 = arith.constant 0.000000e+00 : f32
    %13 = vector.broadcast %cst_3 : f32 to vector<16x128xf32>
    %14 = arith.maximumf %12, %13 : vector<16x128xf32>
    %15 = arith.truncf %14 : vector<16x128xf32> to vector<16x128xbf16>
    %cst_4 = arith.constant dense<0.000000e+00> : vector<8x128xf32>
    %16 = tpu.matmul %5, %15, %cst_4 {dimension_numbers = #tpu.dot_dimension_numbers<[1], [0], [0], [1], [0, 0, 1, 1], [], []>} : vector<8x16xbf16>, vector<16x128xbf16>, vector<8x128xf32> -> vector<8x128xf32>
    %17 = vector.broadcast %6 : vector<8x1xf32> to vector<8x128xf32>
    %18 = arith.addf %16, %17 : vector<8x128xf32>
    %cst_5 = arith.constant 0.000000e+00 : f32
    %19 = vector.broadcast %cst_5 : f32 to vector<8x128xf32>
    %20 = arith.maximumf %18, %19 : vector<8x128xf32>
    %21 = vector.broadcast %7 : vector<8x1xf32> to vector<8x128xf32>
    %22 = arith.mulf %21, %20 : vector<8x128xf32>
    %cst_6 = arith.constant dense<0.000000e+00> : vector<128xf32>
    %23 = vector.multi_reduction <add>, %22, %cst_6 [0] : vector<8x128xf32> to vector<128xf32>
    %24 = vector.shape_cast %23 : vector<128xf32> to vector<1x128xf32>
    %25 = vector.broadcast %8 : vector<1x1xf32> to vector<1x128xf32>
    %26 = arith.addf %24, %25 : vector<1x128xf32>
    %cst_7 = arith.constant 5.000000e-01 : f32
    %27 = vector.broadcast %cst_7 : f32 to vector<1x128xf32>
    %28 = arith.mulf %27, %26 : vector<1x128xf32>
    %29 = math.tanh %28 : vector<1x128xf32>
    %cst_8 = arith.constant 1.000000e+00 : f32
    %30 = vector.broadcast %cst_8 : f32 to vector<1x128xf32>
    %31 = arith.addf %29, %30 : vector<1x128xf32>
    %cst_9 = arith.constant 5.000000e-01 : f32
    %32 = vector.broadcast %cst_9 : f32 to vector<1x128xf32>
    %33 = arith.mulf %32, %31 : vector<1x128xf32>
    %c0_10 = arith.constant 0 : index
    %c0_11 = arith.constant 0 : index
    %34 = vector.load %arg3[%c0_10, %c0_11] : memref<1x128xf32, #tpu.memory_space<vmem>>, vector<1x128xf32>
    tpu.vector_store %arg3[%c0_10, %c0_11], %33 {strides = array<i32>} : memref<1x128xf32, #tpu.memory_space<vmem>>, vector<1x128xf32>,
    return
  }
  func.func @transform_0(%arg0: i32) -> (i32, i32) {
    %c0_i32 = arith.constant 0 : i32
    %c0_i32_0 = arith.constant 0 : i32
    return %c0_i32, %arg0 : i32, i32
  }
  func.func @transform_1(%arg0: i32) -> (i32, i32) {
    %c0_i32 = arith.constant 0 : i32
    %c0_i32_0 = arith.constant 0 : i32
    %c0_i32_1 = arith.constant 0 : i32
    return %c0_i32, %c0_i32_0 : i32, i32
  }
  func.func @transform_2(%arg0: i32) -> (i32, i32) {
    %c0_i32 = arith.constant 0 : i32
    %c0_i32_0 = arith.constant 0 : i32
    return %c0_i32, %arg0 : i32, i32
  }
}

</mosaic_0001>

<bundles_post_ra>
// kernel: survival_model_forward.1
= control target key start
LH: loop header
LB: loop body
LE: loop exit
PB: predicated region body
PF: predicated region fallthrough
CT: control target
= control target key end

     0   :  { %7 = vsyncpa [#allocation3], 0  ;;  %s162_s12 = smov [#allocation2]   ;;  %s163_s14 = smov 128   ;;  %s193_s0 = inlined_call_operand.vmem [shape: bf16[4,128], index: 0, kind: input, shape index: {}]   ;;  %s194_s1 = inlined_call_operand.hbm [shape: f32[32,32], index: 1, kind: input, shape index: {}]   ;;  %s195_s2 = inlined_call_operand.vmem [shape: f32[1,128], index: 2, kind: output, shape index: {}]  }
   0x1   :  { %s14_s11 = sshll.u32 %s194_s1, 4  ;;  %s16_s13 = sshll.u32 %s162_s12, 4  ;;  %s15_s11 = int_to_ptr.hbm [resolvable:$true] %s14_s11  ;;  %s17_s13 = int_to_ptr.vmem [resolvable:$true] %s16_s13 }
   0x2   :  { %s164_s15 = smov 8  }
   0x3   :  { %22 = dma.hbm_to_vmem [thread:$0]  %s15_s11, 512, %s17_s13, [#allocation3], %s163_s14, %s163_s14, %s164_s15  }
   0x4   :  { %160 = dma.done.wait [#allocation3], 512  }
   0x5   :  { %161 = vsyncadd [#allocation3], 4294966784  ;;  %v165_v0 = vmov 4   ;;  %vm49_vm0 = vcmask 1041408   ;;  %v34_v1 = vld [vmem:[%s193_s0] sm:$0x3] }
   0x6   :  { %129 = vset.pattern.permute.xlu0 %v165_v0  ;;  %v28_v2 = vld [vmem:[#allocation2] sm:$0xff]  ;;  %v29_v3 = vld [vmem:[#allocation2 + $0x8] sm:$0xff]  ;;  %v51_v4 = vsel %vm49_vm0, %v34_v1, 0  ;;  %vm45_vm1 = vcmask 31744   ;;  %v30_v6 = vld [vmem:[#allocation2 + $0x10] sm:$0xff]  ;;  %v166_v7 = vmov 16  }
   0x7   :  { %v32_v5 = vpack.c.bf16 %v29_v3, %v28_v2  ;;  %37 = vperm.xlu0 %129, %v28_v2   ;;  %60 = vmatpush.bf16.msra.mxu0 %v51_v4  ;;  %v31_v8 = vld [vmem:[#allocation2 + $0x18] sm:$0xff]  ;;  %v167_v9 = vmov 1   ;;  %v168_v10 = vmov 0   ;;  %v33_v20 = vpack.c.bf16 %v30_v6, %v30_v6 }
   0x8   :  { %130 = vset.pattern.permute.xlu1 %v166_v7  ;;  %132 = vset.pattern.permute.xlu2 %v167_v9  ;;  %vm75_vm2 = vcmask 130048  }
   0x9   :  { %72 = vperm.xlu1 %130, %v30_v6   ;;  %106 = vperm.xlu2 %132, %v31_v8  }
   0xa   :  { %120 = vmatmul.msk.bf16.vlgmr.msra.gmra.mxu0 %vm45_vm1, %v32_v5 }
   0xf   :  { %42 = vperm.xlu0 %129, %v29_v3  }
  0x11   :  { %131 = vset.pattern.permute.xlu1 %v168_v10 }
  0x12   :  { %95 = vperm.xlu1 %131, %v31_v8  }
  0x17   :  { %133 = vset.pattern.permute.xlu0 %v167_v9 }
  0x63   :  { %v107_v33 = vpop.permute.xlu2 %106 }
  0x79   :  { %v38_v11 = vpop.permute.xlu0 %37 }
  0x7b   :  { %v73_v21 = vpop.permute.xlu1 %72 }
  0x81   :  { %v43_v14 = vpop.permute.xlu0 %42 }
  0x84   :  { %v96_v24 = vpop.permute.xlu1 %95 }
  0x87   :  { %v62_v12 = vpop.f32.mrf.mxu0 }
  0x88   :  { %v63_v13 = vadd.f32 %v62_v12, %v38_v11 }
  0x8a   :  { %v67_v17 = vmax.f32 %v63_v13, 0.0 }
  0x8f   :  { %v64_v15 = vpop.f32.mrf.mxu0 }
  0x90   :  { %v65_v16 = vadd.f32 %v64_v15, %v43_v14 }
  0x92   :  { %v68_v18 = vmax.f32 %v65_v16, 0.0 }
  0x94   :  { %v69_v19 = vpack.c.bf16 %v68_v18, %v67_v17 }
  0x96   :  { %86 = vmatpush.bf16.msra.mxu1 %v69_v19 }
  0x99   :  { %121 = vmatmul.msk.bf16.vlgmr.msra.gmra.mxu1 %vm75_vm2, %v33_v20 }
 0x116   :  { %v88_v22 = vpop.f32.mrf.mxu1 }
 0x117   :  { %v89_v23 = vadd.f32 %v88_v22, %v73_v21 }
 0x119   :  { %v92_v25 = vmax.f32 %v89_v23, 0.0 }
 0x11b   :  { %v98_v26 = vmul.f32 %v96_v24, %v92_v25 }
 0x11d   :  { %v99_v27 = vrot.slane %v98_v26, 4 }
 0x11e   :  { %v90_v28 = vpop.f32.mrf.mxu1 }
 0x11f   :  { %v100_v29 = vadd.f32 %v99_v27, %v98_v26 }
 0x121   :  { %v101_v30 = vrot.slane %v100_v29, 2 }
 0x123   :  { %v102_v31 = vadd.f32 %v101_v30, %v100_v29 }
 0x125   :  { %v103_v32 = vrot.slane %v102_v31, 1 }
 0x127   :  { %v104_v34 = vadd.f32 %v103_v32, %v102_v31 }
 0x129   :  { %v109_v35 = vadd.f32 %v107_v33, %v104_v34 }
 0x12b   :  { %v110_v36 = vmul.f32 0.5, %v109_v35 }
 0x12d   :  { %134 = vtanh.f32 %v110_v36 }
 0x133   :  { %v135_v37 = vpop.eup %134 }
 0x134   :  { %v112_v38 = vadd.f32 1.0, %v135_v37 }
 0x136   :  { %v113_v39 = vmul.f32 0.5, %v112_v38 }
 0x138   :  { %114 = vst [vmem:[%s195_s2] sm:$0x1] %v113_v39 }
 0x139   :  { %119 = vsyncpa [#allocation3], 1 }

</bundles_post_ra>
